<compile_context>
chip_gen: v6e
topology: v6e:2x2x1
jax: 0.10.0
libtpu: 0.0.40
codegen_flags: <defaults>
</compile_context>

<pallas_src>
import jax
import jax.numpy as jnp
from jax.experimental import pallas as pl
from jax.experimental.pallas import tpu as pltpu

_LANE = 128
_SUB = 8


def _round_up(x, m):
    return (x + m - 1) // m * m


# ----------------------------- Fused Pallas kernel ---------------------------

def _make_fused_kernel(nb, n, num_blocks, layout, width, out_rows):
    """nb: batch, n: points/batch, num_blocks: # hidden MLP blocks.

    layout: tuple of (row_offset, rows) into the packed weight blob, in the
            exact order the kernel consumes sub-matrices (all multiples of 8).
    width:  padded lane width of activations / weight columns (>= 128).
    out_rows: sublane-padded row count of the output block (multiple of 8).
    """
    M = nb * n

    def kernel(adj_ref, gf_ref, wb_ref, out_ref):
        # Static, tile-aligned views into the packed weight blob (zero-cost).
        cursor = [0]

        def nxt():
            r0, rows = layout[cursor[0]]
            cursor[0] += 1
            return wb_ref[pl.ds(r0, rows), :]          # (rows, width) f32

        flow = adj_ref[...]                            # (M, Din_pad)
        gf = gf_ref[...]                               # (nb, G_pad)

        aggr = None
        for li in range(num_blocks):                   # statically unrolled
            if li == 0:
                w1f, w1g = nxt(), nxt()
                b1, w2, b2 = nxt(), nxt(), nxt()
                # per-batch part of Linear-1 (gf rows are identical per batch)
                pb = jnp.dot(gf, w1g,
                             preferred_element_type=jnp.float32) + b1[0:1, :]
            else:
                w1f, w1g, w1a = nxt(), nxt(), nxt()
                b1, w2, b2 = nxt(), nxt(), nxt()
                pb = (jnp.dot(gf, w1g, preferred_element_type=jnp.float32)
                      + jnp.dot(aggr, w1a, preferred_element_type=jnp.float32)
                      + b1[0:1, :])
            # x @ W1 == flow @ W1_flow + expand(gf @ W1_gf [+ aggr @ W1_aggr] + b1)
            h = jnp.dot(flow, w1f,
                        preferred_element_type=jnp.float32)       # (M, width)
            h = h.reshape(nb, n, width) + pb[:, None, :]  # per-batch bias (bcast)
            h = jnp.maximum(h, 0.2 * h)                   # LeakyReLU(0.2)
            h = h.reshape(M, width)
            y = jnp.dot(h, w2,
                        preferred_element_type=jnp.float32) + b2[0:1, :]
            aggr = y.reshape(nb, n, width).sum(axis=1)    # per-batch point-sum
            flow = y

        w_last, b_last = nxt(), nxt()
        out = jnp.dot(aggr, w_last,
                      preferred_element_type=jnp.float32) + b_last[0:1, :]
        if out_rows > nb:                              # sublane-pad -> unmasked store
            out = jnp.concatenate(
                [out, jnp.zeros((out_rows - nb, width), jnp.float32)], axis=0)
        out_ref[...] = out

    return kernel


# ----------------------------- Weight packing ---------------------------------

def _pack_params(params, input_dim, g, hidden_dim, width):
    """Pack every weight/bias into one (R, width) zero-padded f32 blob.

    Returns (blob, layout) with layout = tuple of (row_offset, rows) in kernel
    consumption order.  Offsets / row counts are multiples of 8 so all in-kernel
    views are (8,128)-tile aligned.  Matrices that contract against a
    width-lane activation get `width` rows (zero rows beyond their true size).
    """
    H = hidden_dim
    din_p = _round_up(input_dim, _SUB)
    g_p = _round_up(g, _SUB)

    pieces, layout, off = [], [], 0

    def add(mat, rows):
        nonlocal off
        r, c = mat.shape
        assert r <= rows and c <= width
        pieces.append(jnp.pad(mat.astype(jnp.float32),
                              ((0, rows - r), (0, width - c))))
        layout.append((off, rows))
        off += rows

    for i, (w1, b1, w2, b2) in enumerate(params["hidden"]):
        if i == 0:
            add(w1[:input_dim], din_p)         # W1_flow (flow = adj, Din_pad lanes)
            add(w1[input_dim:], g_p)           # W1_gf
        else:
            add(w1[:H], width)                 # W1_flow (flow is width lanes wide)
            add(w1[H:H + g], g_p)              # W1_gf
            add(w1[H + g:], width)             # W1_aggr (aggr is width lanes wide)
        add(b1, _SUB)                          # bias lives in row 0
        add(w2, width)                         # h is width lanes wide
        add(b2, _SUB)
    add(params["w_last"], width)               # aggr is width lanes wide
    add(params["b_last"], _SUB)

    return jnp.concatenate(pieces, axis=0), tuple(layout)


# ----------------------------- Model wrapper ----------------------------------

def init_params(key, input_dim, stats_latent_size, hidden_dim, output_dim,
                n_layers):
    """Deterministic synthetic parameters matching the module's shapes.

    Weights are stored as (in_features, out_features) == W^T of torch layout.
    """
    params = {"hidden": []}
    n_hidden_blocks = 1 + (n_layers - 2)    # input_layer + (n_layers - 2) blocks
    for i in range(n_hidden_blocks):
        din = (input_dim + stats_latent_size) if i == 0 \
            else (2 * hidden_dim + stats_latent_size)
        key, k1, k2, k3, k4 = jax.random.split(key, 5)
        w1 = 0.1 * jax.random.normal(k1, (din, hidden_dim), jnp.float32)
        b1 = 0.1 * jax.random.normal(k2, (1, hidden_dim), jnp.float32)
        w2 = 0.1 * jax.random.normal(k3, (hidden_dim, hidden_dim), jnp.float32)
        b2 = 0.1 * jax.random.normal(k4, (1, hidden_dim), jnp.float32)
        params["hidden"].append((w1, b1, w2, b2))
    key, k1, k2 = jax.random.split(key, 3)
    params["w_last"] = 0.1 * jax.random.normal(k1, (hidden_dim, output_dim),
                                               jnp.float32)
    params["b_last"] = 0.1 * jax.random.normal(k2, (1, output_dim), jnp.float32)
    return params


@jax.jit
def global_modifications_forward(params, adj, global_features):
    b, n, input_dim = adj.shape
    g = global_features.shape[1]
    hidden_dim = params["hidden"][0][0].shape[1]
    out_dim = params["w_last"].shape[1]
    num_blocks = len(params["hidden"])

    width = max(_LANE, _round_up(hidden_dim, _LANE), _round_up(out_dim, _LANE))
    din_p = _round_up(input_dim, _SUB)
    g_p = _round_up(g, _SUB)
    out_rows = _round_up(b, _SUB)
    M = b * n

    # Exactly 3 kernel inputs: flattened adj, global features, packed weights.
    # (Packing/padding here is plain XLA outside the kernel; in a real pipeline
    #  the blob would be built once and cached.)
    adj2 = jnp.pad(adj.reshape(M, input_dim).astype(jnp.float32),
                   ((0, 0), (0, din_p - input_dim)))
    gf2 = jnp.pad(global_features.astype(jnp.float32),
                  ((0, 0), (0, g_p - g)))
    blob, layout = _pack_params(params, input_dim, g, hidden_dim, width)

    kernel = _make_fused_kernel(b, n, num_blocks, layout, width, out_rows)
    out = pl.pallas_call(
        kernel,
        out_shape=jax.ShapeDtypeStruct((out_rows, width), jnp.float32),
        grid_spec=pltpu.PrefetchScalarGridSpec(
            num_scalar_prefetch=0,
            grid=(1,),                                  # single resident step
            in_specs=[
                pl.BlockSpec((M, din_p), lambda i: (0, 0)),
                pl.BlockSpec((b, g_p), lambda i: (0, 0)),
                pl.BlockSpec(blob.shape, lambda i: (0, 0)),
            ],
            out_specs=pl.BlockSpec((out_rows, width), lambda i: (0, 0))),
        compiler_params=pltpu.CompilerParams(
            dimension_semantics=("arbitrary",)),        # trivially small work
    )(adj2, gf2, blob)

    out = out[:b, :out_dim]
    # aggr rows are identical per batch in the reference module -> exact.
    return jnp.broadcast_to(out[:, None, :], (b, n, out_dim))


def reference_forward(params, adj, global_features):
    """Pure-JAX reference (f32, HIGHEST matmul precision) for the check."""
    hp = jax.lax.Precision.HIGHEST
    b, n, _ = adj.shape
    g = global_features.shape[1]
    gf = jnp.broadcast_to(global_features[:, None, :], (b, n, g))
    flow = jnp.concatenate([adj, gf], axis=-1)
    aggr = None
    for (w1, b1, w2, b2) in params["hidden"]:
        h = jnp.dot(flow, w1, precision=hp) + b1
        h = jnp.where(h > 0, h, 0.2 * h)
        y = jnp.dot(h, w2, precision=hp) + b2
        aggr = jnp.sum(y, axis=1, keepdims=True)
        aggr_exp = jnp.broadcast_to(aggr, (b, n, y.shape[-1]))
        flow = jnp.concatenate([y, gf, aggr_exp], axis=-1)
    out = jnp.dot(jnp.broadcast_to(aggr, (b, n, aggr.shape[-1])),
                  params["w_last"], precision=hp) + params["b_last"]
    return out


# --------------------------------- Main ----------------------------------------

if __name__ == "__main__":
    b, n = 2, 16
    input_dim = 16            # adj: (b, n, input_dim)
    stats_latent_size = 8
    hidden_dim = 32
    output_dim = 16
    n_layers = 3              # -> 2 hidden MLP blocks + last linear

    key = jax.random.PRNGKey(0)
    key, ka, kg, kp = jax.random.split(key, 4)
    adj = 0.1 * jax.random.normal(ka, (b, n, input_dim), jnp.float32)
    global_features = 0.1 * jax.random.normal(kg, (b, stats_latent_size),
                                              jnp.float32)
    params = init_params(kp, input_dim, stats_latent_size, hidden_dim,
                         output_dim, n_layers)

    out = global_modifications_forward(params, adj, global_features)
    out = jax.block_until_ready(out)

    ref = reference_forward(params, adj, global_features)
    assert out.shape == (b, n, output_dim), out.shape
    err = float(jnp.max(jnp.abs(out - ref)))
    assert err < 1e-3, err    # slack for MXU pass-precision differences

    print("KERNEL_OK")
</pallas_src>

<mosaic_0001>
module attributes {stable_mosaic.version = 11 : i64} {
  func.func @kernel(%arg0: i32, %arg1: memref<32x16xf32, #tpu.memory_space<vmem>>, %arg2: memref<2x8xf32, #tpu.memory_space<vmem>>, %arg3: memref<712x128xf32, #tpu.memory_space<vmem>>, %arg4: memref<8x128xf32, #tpu.memory_space<vmem>>) attributes {dimension_semantics = [#tpu.dimension_semantics<arbitrary>], iteration_bounds = array<i64: 1>, scalar_prefetch = 0 : i64, scratch_operands = 0 : i64, tpu.core_type = #tpu.core_type<tc>, window_params = [{pipeline_mode = #tpu.pipeline_mode<synchronous>, transform_indices = @transform_0, window_bounds = array<i64: 32, 16>}, {pipeline_mode = #tpu.pipeline_mode<synchronous>, transform_indices = @transform_1, window_bounds = array<i64: 2, 8>}, {pipeline_mode = #tpu.pipeline_mode<synchronous>, transform_indices = @transform_2, window_bounds = array<i64: 712, 128>}, {pipeline_mode = #tpu.pipeline_mode<synchronous>, transform_indices = @transform_3, window_bounds = array<i64: 8, 128>}]} {
    %c0 = arith.constant 0 : index
    %c0_0 = arith.constant 0 : index
    %0 = vector.load %arg1[%c0, %c0_0] : memref<32x16xf32, #tpu.memory_space<vmem>>, vector<32x16xf32>
    %c0_1 = arith.constant 0 : index
    %c0_2 = arith.constant 0 : index
    %1 = vector.load %arg2[%c0_1, %c0_2] : memref<2x8xf32, #tpu.memory_space<vmem>>, vector<2x8xf32>
    %c0_3 = arith.constant 0 : index
    %c0_4 = arith.constant 0 : index
    %2 = vector.load %arg3[%c0_3, %c0_4] : memref<712x128xf32, #tpu.memory_space<vmem>>, vector<16x128xf32>
    %c16 = arith.constant 16 : index
    %c0_5 = arith.constant 0 : index
    %3 = vector.load %arg3[%c16, %c0_5] : memref<712x128xf32, #tpu.memory_space<vmem>>, vector<8x128xf32>
    %c24 = arith.constant 24 : index
    %c0_6 = arith.constant 0 : index
    %4 = vector.load %arg3[%c24, %c0_6] : memref<712x128xf32, #tpu.memory_space<vmem>>, vector<8x128xf32>
    %c32 = arith.constant 32 : index
    %c0_7 = arith.constant 0 : index
    %5 = vector.load %arg3[%c32, %c0_7] : memref<712x128xf32, #tpu.memory_space<vmem>>, vector<128x128xf32>
    %c160 = arith.constant 160 : index
    %c0_8 = arith.constant 0 : index
    %6 = vector.load %arg3[%c160, %c0_8] : memref<712x128xf32, #tpu.memory_space<vmem>>, vector<8x128xf32>
    %cst = arith.constant dense<0.000000e+00> : vector<2x128xf32>
    %7 = tpu.matmul %1, %3, %cst {dimension_numbers = #tpu.dot_dimension_numbers<[1], [0], [0], [1], [0, 0, 1, 1], [], []>} : vector<2x8xf32>, vector<8x128xf32>, vector<2x128xf32> -> vector<2x128xf32>
    %8 = vector.extract_strided_slice %4 {offsets = [0, 0], sizes = [1, 128], strides = [1, 1]} : vector<8x128xf32> to vector<1x128xf32>
    %9 = vector.broadcast %8 : vector<1x128xf32> to vector<2x128xf32>
    %10 = arith.addf %7, %9 : vector<2x128xf32>
    %cst_9 = arith.constant dense<0.000000e+00> : vector<32x128xf32>
    %11 = tpu.matmul %0, %2, %cst_9 {dimension_numbers = #tpu.dot_dimension_numbers<[1], [0], [0], [1], [0, 0, 1, 1], [], []>} : vector<32x16xf32>, vector<16x128xf32>, vector<32x128xf32> -> vector<32x128xf32>
    %12 = vector.shape_cast %11 : vector<32x128xf32> to vector<2x16x128xf32>
    %13 = vector.shape_cast %10 : vector<2x128xf32> to vector<2x1x128xf32>
    %14 = vector.broadcast %13 : vector<2x1x128xf32> to vector<2x16x128xf32>
    %15 = arith.addf %12, %14 : vector<2x16x128xf32>
    %cst_10 = arith.constant 2.000000e-01 : f32
    %16 = vector.broadcast %cst_10 : f32 to vector<2x16x128xf32>
    %17 = arith.mulf %16, %15 : vector<2x16x128xf32>
    %18 = arith.maximumf %15, %17 : vector<2x16x128xf32>
    %19 = vector.shape_cast %18 : vector<2x16x128xf32> to vector<32x128xf32>
    %cst_11 = arith.constant dense<0.000000e+00> : vector<32x128xf32>
    %20 = tpu.matmul %19, %5, %cst_11 {dimension_numbers = #tpu.dot_dimension_numbers<[1], [0], [0], [1], [0, 0, 1, 1], [], []>} : vector<32x128xf32>, vector<128x128xf32>, vector<32x128xf32> -> vector<32x128xf32>
    %21 = vector.extract_strided_slice %6 {offsets = [0, 0], sizes = [1, 128], strides = [1, 1]} : vector<8x128xf32> to vector<1x128xf32>
    %22 = vector.broadcast %21 : vector<1x128xf32> to vector<32x128xf32>
    %23 = arith.addf %20, %22 : vector<32x128xf32>
    %24 = vector.shape_cast %23 : vector<32x128xf32> to vector<2x16x128xf32>
    %cst_12 = arith.constant dense<0.000000e+00> : vector<2x128xf32>
    %25 = vector.multi_reduction <add>, %24, %cst_12 [1] : vector<2x16x128xf32> to vector<2x128xf32>
    %c168 = arith.constant 168 : index
    %c0_13 = arith.constant 0 : index
    %26 = vector.load %arg3[%c168, %c0_13] : memref<712x128xf32, #tpu.memory_space<vmem>>, vector<128x128xf32>
    %c296 = arith.constant 296 : index
    %c0_14 = arith.constant 0 : index
    %27 = vector.load %arg3[%c296, %c0_14] : memref<712x128xf32, #tpu.memory_space<vmem>>, vector<8x128xf32>
    %c304 = arith.constant 304 : index
    %c0_15 = arith.constant 0 : index
    %28 = vector.load %arg3[%c304, %c0_15] : memref<712x128xf32, #tpu.memory_space<vmem>>, vector<128x128xf32>
    %c432 = arith.constant 432 : index
    %c0_16 = arith.constant 0 : index
    %29 = vector.load %arg3[%c432, %c0_16] : memref<712x128xf32, #tpu.memory_space<vmem>>, vector<8x128xf32>
    %c440 = arith.constant 440 : index
    %c0_17 = arith.constant 0 : index
    %30 = vector.load %arg3[%c440, %c0_17] : memref<712x128xf32, #tpu.memory_space<vmem>>, vector<128x128xf32>
    %c568 = arith.constant 568 : index
    %c0_18 = arith.constant 0 : index
    %31 = vector.load %arg3[%c568, %c0_18] : memref<712x128xf32, #tpu.memory_space<vmem>>, vector<8x128xf32>
    %cst_19 = arith.constant dense<0.000000e+00> : vector<2x128xf32>
    %32 = tpu.matmul %1, %27, %cst_19 {dimension_numbers = #tpu.dot_dimension_numbers<[1], [0], [0], [1], [0, 0, 1, 1], [], []>} : vector<2x8xf32>, vector<8x128xf32>, vector<2x128xf32> -> vector<2x128xf32>
    %cst_20 = arith.constant dense<0.000000e+00> : vector<2x128xf32>
    %33 = tpu.matmul %25, %28, %cst_20 {dimension_numbers = #tpu.dot_dimension_numbers<[1], [0], [0], [1], [0, 0, 1, 1], [], []>} : vector<2x128xf32>, vector<128x128xf32>, vector<2x128xf32> -> vector<2x128xf32>
    %34 = arith.addf %32, %33 : vector<2x128xf32>
    %35 = vector.extract_strided_slice %29 {offsets = [0, 0], sizes = [1, 128], strides = [1, 1]} : vector<8x128xf32> to vector<1x128xf32>
    %36 = vector.broadcast %35 : vector<1x128xf32> to vector<2x128xf32>
    %37 = arith.addf %34, %36 : vector<2x128xf32>
    %cst_21 = arith.constant dense<0.000000e+00> : vector<32x128xf32>
    %38 = tpu.matmul %23, %26, %cst_21 {dimension_numbers = #tpu.dot_dimension_numbers<[1], [0], [0], [1], [0, 0, 1, 1], [], []>} : vector<32x128xf32>, vector<128x128xf32>, vector<32x128xf32> -> vector<32x128xf32>
    %39 = vector.shape_cast %38 : vector<32x128xf32> to vector<2x16x128xf32>
    %40 = vector.shape_cast %37 : vector<2x128xf32> to vector<2x1x128xf32>
    %41 = vector.broadcast %40 : vector<2x1x128xf32> to vector<2x16x128xf32>
    %42 = arith.addf %39, %41 : vector<2x16x128xf32>
    %cst_22 = arith.constant 2.000000e-01 : f32
    %43 = vector.broadcast %cst_22 : f32 to vector<2x16x128xf32>
    %44 = arith.mulf %43, %42 : vector<2x16x128xf32>
    %45 = arith.maximumf %42, %44 : vector<2x16x128xf32>
    %46 = vector.shape_cast %45 : vector<2x16x128xf32> to vector<32x128xf32>
    %cst_23 = arith.constant dense<0.000000e+00> : vector<32x128xf32>
    %47 = tpu.matmul %46, %30, %cst_23 {dimension_numbers = #tpu.dot_dimension_numbers<[1], [0], [0], [1], [0, 0, 1, 1], [], []>} : vector<32x128xf32>, vector<128x128xf32>, vector<32x128xf32> -> vector<32x128xf32>
    %48 = vector.extract_strided_slice %31 {offsets = [0, 0], sizes = [1, 128], strides = [1, 1]} : vector<8x128xf32> to vector<1x128xf32>
    %49 = vector.broadcast %48 : vector<1x128xf32> to vector<32x128xf32>
    %50 = arith.addf %47, %49 : vector<32x128xf32>
    %51 = vector.shape_cast %50 : vector<32x128xf32> to vector<2x16x128xf32>
    %cst_24 = arith.constant dense<0.000000e+00> : vector<2x128xf32>
    %52 = vector.multi_reduction <add>, %51, %cst_24 [1] : vector<2x16x128xf32> to vector<2x128xf32>
    %c576 = arith.constant 576 : index
    %c0_25 = arith.constant 0 : index
    %53 = vector.load %arg3[%c576, %c0_25] : memref<712x128xf32, #tpu.memory_space<vmem>>, vector<128x128xf32>
    %c704 = arith.constant 704 : index
    %c0_26 = arith.constant 0 : index
    %54 = vector.load %arg3[%c704, %c0_26] : memref<712x128xf32, #tpu.memory_space<vmem>>, vector<8x128xf32>
    %cst_27 = arith.constant dense<0.000000e+00> : vector<2x128xf32>
    %55 = tpu.matmul %52, %53, %cst_27 {dimension_numbers = #tpu.dot_dimension_numbers<[1], [0], [0], [1], [0, 0, 1, 1], [], []>} : vector<2x128xf32>, vector<128x128xf32>, vector<2x128xf32> -> vector<2x128xf32>
    %56 = vector.extract_strided_slice %54 {offsets = [0, 0], sizes = [1, 128], strides = [1, 1]} : vector<8x128xf32> to vector<1x128xf32>
    %57 = vector.broadcast %56 : vector<1x128xf32> to vector<2x128xf32>
    %58 = arith.addf %55, %57 : vector<2x128xf32>
    %cst_28 = arith.constant 0.000000e+00 : f32
    %59 = vector.broadcast %cst_28 : f32 to vector<6x128xf32>
    %60 = tpu.concatenate %58, %59 in 0 : vector<2x128xf32>, vector<6x128xf32> -> vector<8x128xf32>
    %c0_29 = arith.constant 0 : index
    %c0_30 = arith.constant 0 : index
    %61 = vector.load %arg4[%c0_29, %c0_30] : memref<8x128xf32, #tpu.memory_space<vmem>>, vector<8x128xf32>
    tpu.vector_store %arg4[%c0_29, %c0_30], %60 {strides = array<i32>} : memref<8x128xf32, #tpu.memory_space<vmem>>, vector<8x128xf32>,
    return
  }
  func.func @transform_0(%arg0: i32) -> (i32, i32) {
    %c0_i32 = arith.constant 0 : i32
    %c0_i32_0 = arith.constant 0 : i32
    %c0_i32_1 = arith.constant 0 : i32
    return %c0_i32, %c0_i32_0 : i32, i32
  }
  func.func @transform_1(%arg0: i32) -> (i32, i32) {
    %c0_i32 = arith.constant 0 : i32
    %c0_i32_0 = arith.constant 0 : i32
    %c0_i32_1 = arith.constant 0 : i32
    return %c0_i32, %c0_i32_0 : i32, i32
  }
  func.func @transform_2(%arg0: i32) -> (i32, i32) {
    %c0_i32 = arith.constant 0 : i32
    %c0_i32_0 = arith.constant 0 : i32
    %c0_i32_1 = arith.constant 0 : i32
    return %c0_i32, %c0_i32_0 : i32, i32
  }
  func.func @transform_3(%arg0: i32) -> (i32, i32) {
    %c0_i32 = arith.constant 0 : i32
    %c0_i32_0 = arith.constant 0 : i32
    %c0_i32_1 = arith.constant 0 : i32
    return %c0_i32, %c0_i32_0 : i32, i32
  }
}

</mosaic_0001>

<bundles_post_ra>
// kernel: global_modifications_forward.1
= control target key start
LH: loop header
LB: loop body
LE: loop exit
PB: predicated region body
PF: predicated region fallthrough
CT: control target
= control target key end

     0   :  { %vm44_vm0 = vcmask 64512   ;;  %v1217_v0 = vmov 0.0   ;;  %vm1218_vm1 = vmmov 0   ;;  %vm118_vm2 = vcmask 130048   ;;  %s1598_s2 = inlined_call_operand.vmem [shape: f32[712,128], index: 2, kind: input, shape index: {}]   ;;  %s1599_s1 = inlined_call_operand.vmem [shape: f32[2,8], index: 1, kind: input, shape index: {}]   ;;  %s1600_s0 = inlined_call_operand.vmem [shape: f32[32,16], index: 0, kind: input, shape index: {}]   ;;  %s1601_s3 = inlined_call_operand.vmem [shape: f32[8,128], index: 3, kind: output, shape index: {}]  }
   0x1   :  { %1010 = vmatprep.subr.mxu1 %v1217_v0  ;;  %v21_v1 = vld [vmem:[%s1598_s2 + $0x10] sm:$0xff]  ;;  %1012 = vmatprep.mubr.msk.f32.mxu1 %vm1218_vm1, %v1217_v0  ;;  %v1249_v2 = vld [vmem:[%s1599_s1] sm:$0x3]  ;;  %v20_v3 = vld [vmem:[%s1598_s2 + $0x8] sm:$0xff]  ;;  %v40_v30 = vlaneseq  ;;  %v1219_v32 = vmov 1966171168  }
   0x2   :  { %1011 = vmatpush3.msra.mxu1 %v21_v1  ;;  %v19_v4 = vld [vmem:[%s1598_s2] sm:$0xff]  ;;  %v38_v6 = vld [vmem:[%s1598_s2 + $0x98] sm:$0xff]  ;;  %v15_v7 = vld [vmem:[%s1600_s0 + $0x8] sm:$0xff]  ;;  %v218_v33 = vunpack.c.l.s4 %v1219_v32  ;;  %vm417_vm3 = vcmask 1041409   ;;  %vm893_vm4 = vcmask 1041408  }
   0x3   :  { %v14_v5 = vld [vmem:[%s1600_s0] sm:$0xff]  ;;  %1013 = vmatmul.mubr.msk.f32.vlgmr.msra.gmra.mxu1 %vm44_vm0, %v1249_v2  ;;  %1015 = vmatprep.subr.mxu1 %v20_v3  ;;  %v37_v8 = vld [vmem:[%s1598_s2 + $0x90] sm:$0xff]  ;;  %v36_v10 = vld [vmem:[%s1598_s2 + $0x88] sm:$0xff]  ;;  %v41_v31 = vshrl.u32 %v40_v30, 7 }
   0x4   :  { %1016 = vmatpush3.msra.mxu1 %v20_v3  ;;  %1019 = vmatprep.mubr.msk.f32.mxu1 %vm118_vm2, %v14_v5  ;;  %v16_v9 = vld [vmem:[%s1600_s0 + $0x10] sm:$0xff]  ;;  %v17_v11 = vld [vmem:[%s1600_s0 + $0x18] sm:$0xff]  ;;  %v35_v12 = vld [vmem:[%s1598_s2 + $0x80] sm:$0xff]  ;;  %v219_v36 = vunpack.c.0.s8 %v218_v33 }
   0x5   :  { %1017 = vmatprep.subr.mxu1 %v19_v4  ;;  %1025 = vmatprep.subr.mxu0 %v38_v6  ;;  %v34_v13 = vld [vmem:[%s1598_s2 + $0x78] sm:$0xff]  ;;  %v33_v14 = vld [vmem:[%s1598_s2 + $0x70] sm:$0xff]  ;;  %v32_v15 = vld [vmem:[%s1598_s2 + $0x68] sm:$0xff]  ;;  %v1345_v34 = vsub.s32 0, %v41_v31 }
   0x6   :  { %1018 = vmatpush3.msra.mxu1 %v19_v4  ;;  %1026 = vmatpush3.msra.mxu0 %v38_v6  ;;  %v31_v16 = vld [vmem:[%s1598_s2 + $0x60] sm:$0xff]  ;;  %v30_v17 = vld [vmem:[%s1598_s2 + $0x58] sm:$0xff]  ;;  %v29_v18 = vld [vmem:[%s1598_s2 + $0x50] sm:$0xff]  ;;  %v1351_v38 = vsub.s32 %v219_v36, %v41_v31 }
   0x7   :  { %1020 = vmatmul.mubr.msk.f32.vlgmr.msra.gmra.mxu1 %vm118_vm2, %v15_v7  ;;  %1027 = vmatprep.subr.mxu0 %v37_v8  ;;  %v28_v19 = vld [vmem:[%s1598_s2 + $0x48] sm:$0xff]  ;;  %v27_v20 = vld [vmem:[%s1598_s2 + $0x40] sm:$0xff]  ;;  %v26_v21 = vld [vmem:[%s1598_s2 + $0x38] sm:$0xff] }
   0x8   :  { %1022 = vmatprep.mubr.msk.f32.mxu1 %vm118_vm2, %v16_v9  ;;  %1028 = vmatpush3.msra.mxu0 %v37_v8  ;;  %v25_v22 = vld [vmem:[%s1598_s2 + $0x30] sm:$0xff]  ;;  %v24_v23 = vld [vmem:[%s1598_s2 + $0x28] sm:$0xff]  ;;  %v23_v24 = vld [vmem:[%s1598_s2 + $0x20] sm:$0xff] }
   0x9   :  { %1029 = vmatprep.subr.mxu0 %v36_v10  ;;  %1063 = vmatprep.subr.mxu1 %v1217_v0  ;;  %v379_v25 = vld [vmem:[%s1598_s2 + $0x120] sm:$0xff]  ;;  %v396_v26 = vld [vmem:[%s1598_s2 + $0x1a8] sm:$0xff]  ;;  %v394_v28 = vld [vmem:[%s1598_s2 + $0x198] sm:$0xff] }
   0xa   :  { %1030 = vmatpush3.msra.mxu0 %v36_v10  ;;  %1064 = vmatpush3.msra.mxu1 %v396_v26  ;;  %v395_v27 = vld [vmem:[%s1598_s2 + $0x1a0] sm:$0xff]  ;;  %v393_v29 = vld [vmem:[%s1598_s2 + $0x190] sm:$0xff]  ;;  %v22_v35 = vld [vmem:[%s1598_s2 + $0x18] sm:$0xff] }
   0xb   :  { %1023 = vmatmul.mubr.msk.f32.gmra.mxu1 %vm118_vm2, %v17_v11  ;;  %1031 = vmatprep.subr.mxu0 %v35_v12  ;;  %v43_v37 = vrot.slane %v22_v35, %v1345_v34  ;;  %v378_v63 = vld [vmem:[%s1598_s2 + $0x118] sm:$0xff]  ;;  %v377_v1 = vld [vmem:[%s1598_s2 + $0x110] sm:$0xff]  ;;  %v376_v4 = vld [vmem:[%s1598_s2 + $0x108] sm:$0xff] }
   0xc   :  { %1032 = vmatpush3.msra.mxu0 %v35_v12  ;;  %1095 = vmatprep.mubr.msk.f32.mxu1 %vm1218_vm1, %v1217_v0  ;;  %v375_v5 = vld [vmem:[%s1598_s2 + $0x100] sm:$0xff]  ;;  %v374_v6 = vld [vmem:[%s1598_s2 + $0xf8] sm:$0xff]  ;;  %v373_v7 = vld [vmem:[%s1598_s2 + $0xf0] sm:$0xff] }
   0xd   :  { %1033 = vmatprep.subr.mxu0 %v34_v13  ;;  %1065 = vmatprep.subr.mxu1 %v1217_v0  ;;  %v372_v8 = vld [vmem:[%s1598_s2 + $0xe8] sm:$0xff]  ;;  %v371_v9 = vld [vmem:[%s1598_s2 + $0xe0] sm:$0xff]  ;;  %v370_v10 = vld [vmem:[%s1598_s2 + $0xd8] sm:$0xff] }
   0xe   :  { %1034 = vmatpush3.msra.mxu0 %v34_v13  ;;  %1066 = vmatpush3.msra.mxu1 %v395_v27  ;;  %v369_v11 = vld [vmem:[%s1598_s2 + $0xd0] sm:$0xff]  ;;  %v368_v12 = vld [vmem:[%s1598_s2 + $0xc8] sm:$0xff]  ;;  %v367_v13 = vld [vmem:[%s1598_s2 + $0xc0] sm:$0xff] }
   0xf   :  { %1035 = vmatprep.subr.mxu0 %v33_v14  ;;  %1067 = vmatprep.subr.mxu1 %v1217_v0  ;;  %v383_v26 = vld [vmem:[%s1598_s2 + $0x140] sm:$0xff]  ;;  %v382_v27 = vld [vmem:[%s1598_s2 + $0x138] sm:$0xff] }
  0x10   :  { %1036 = vmatpush3.msra.mxu0 %v33_v14  ;;  %1068 = vmatpush3.msra.mxu1 %v394_v28  ;;  %v366_v14 = vld [vmem:[%s1598_s2 + $0xb8] sm:$0xff]  ;;  %v381_v28 = vld [vmem:[%s1598_s2 + $0x130] sm:$0xff] }
  0x11   :  { %1037 = vmatprep.subr.mxu0 %v32_v15  ;;  %1069 = vmatprep.subr.mxu1 %v1217_v0 }
  0x12   :  { %1038 = vmatpush3.msra.mxu0 %v32_v15  ;;  %1070 = vmatpush3.msra.mxu1 %v393_v29  ;;  %v392_v15 = vld [vmem:[%s1598_s2 + $0x188] sm:$0xff]  ;;  %v39_v29 = vld [vmem:[%s1598_s2 + $0xa0] sm:$0xff] }
  0x13   :  { %1039 = vmatprep.subr.mxu0 %v31_v16  ;;  %1071 = vmatprep.subr.mxu1 %v1217_v0  ;;  %v264_v30 = vrot.slane %v39_v29, %v1345_v34 }
  0x14   :  { %1040 = vmatpush3.msra.mxu0 %v31_v16  ;;  %1072 = vmatpush3.msra.mxu1 %v392_v15  ;;  %v365_v16 = vld [vmem:[%s1598_s2 + $0xb0] sm:$0xff] }
  0x15   :  { %1041 = vmatprep.subr.mxu0 %v30_v17  ;;  %1073 = vmatprep.subr.mxu1 %v1217_v0  ;;  %v397_v15 = vld [vmem:[%s1598_s2 + $0x1b0] sm:$0xff] }
  0x16   :  { %1042 = vmatpush3.msra.mxu0 %v30_v17  ;;  %v391_v17 = vld [vmem:[%s1598_s2 + $0x180] sm:$0xff] }
  0x17   :  { %1043 = vmatprep.subr.mxu0 %v29_v18  ;;  %1074 = vmatpush3.msra.mxu1 %v391_v17  ;;  %v563_v17 = vrot.slane %v397_v15, %v1345_v34 }
  0x18   :  { %1044 = vmatpush3.msra.mxu0 %v29_v18  ;;  %v364_v18 = vld [vmem:[%s1598_s2 + $0xa8] sm:$0xff]  ;;  %1075 = vmatprep.subr.mxu1 %v1217_v0 }
  0x19   :  { %1045 = vmatprep.subr.mxu0 %v28_v19 }
  0x1a   :  { %1046 = vmatpush3.msra.mxu0 %v28_v19  ;;  %v390_v19 = vld [vmem:[%s1598_s2 + $0x178] sm:$0xff] }
  0x1b   :  { %1047 = vmatprep.subr.mxu0 %v27_v20  ;;  %1076 = vmatpush3.msra.mxu1 %v390_v19 }
  0x1c   :  { %1048 = vmatpush3.msra.mxu0 %v27_v20  ;;  %1077 = vmatprep.subr.mxu1 %v1217_v0  ;;  %v389_v20 = vld [vmem:[%s1598_s2 + $0x170] sm:$0xff] }
  0x1d   :  { %1049 = vmatprep.subr.mxu0 %v26_v21  ;;  %1078 = vmatpush3.msra.mxu1 %v389_v20 }
  0x1e   :  { %1050 = vmatpush3.msra.mxu0 %v26_v21  ;;  %1079 = vmatprep.subr.mxu1 %v1217_v0  ;;  %v388_v21 = vld [vmem:[%s1598_s2 + $0x168] sm:$0xff] }
  0x1f   :  { %1051 = vmatprep.subr.mxu0 %v25_v22  ;;  %1080 = vmatpush3.msra.mxu1 %v388_v21 }
  0x20   :  { %1052 = vmatpush3.msra.mxu0 %v25_v22  ;;  %1081 = vmatprep.subr.mxu1 %v1217_v0  ;;  %v387_v22 = vld [vmem:[%s1598_s2 + $0x160] sm:$0xff] }
  0x21   :  { %1053 = vmatprep.subr.mxu0 %v24_v23  ;;  %1082 = vmatpush3.msra.mxu1 %v387_v22 }
  0x22   :  { %1054 = vmatpush3.msra.mxu0 %v24_v23  ;;  %1083 = vmatprep.subr.mxu1 %v1217_v0  ;;  %v386_v23 = vld [vmem:[%s1598_s2 + $0x158] sm:$0xff] }
  0x23   :  { %1055 = vmatprep.subr.mxu0 %v23_v24  ;;  %1084 = vmatpush3.msra.mxu1 %v386_v23 }
  0x24   :  { %1056 = vmatpush3.msra.mxu0 %v23_v24  ;;  %1085 = vmatprep.subr.mxu1 %v1217_v0  ;;  %v385_v24 = vld [vmem:[%s1598_s2 + $0x150] sm:$0xff] }
  0x25   :  { %1103 = vmatprep.subr.mxu0 %v379_v25  ;;  %1086 = vmatpush3.msra.mxu1 %v385_v24 }
  0x26   :  { %1087 = vmatprep.subr.mxu1 %v1217_v0 }
  0xc3   :  { %v114_v39 = vpop.f32.mrf.mxu1 }
  0xc4   :  { %v115_v40 = vadd.f32 %v114_v39, %v43_v37 }
  0xc5   :  { %v1014_v41 = vpop.f32.mrf.mxu1 }
  0xc6   :  { %v223_v42 = vrot.slane %v115_v40, %v1351_v38 }
  0xc7   :  { %v1021_v43 = vpop.f32.mrf.mxu1 }
  0xc8   :  { %v224_v44 = vcombine.high %v223_v42, %v223_v42  ;;  %v231_v45 = vrot.slane %v223_v42, %v1351_v38 }
  0xc9   :  { %v197_v46 = vpop.f32.mrf.mxu1 }
  0xca   :  { %v242_v47 = vrot.slane %v231_v45, %v1345_v34  ;;  %v238_v48 = vrot.slane %v224_v44, %v1351_v38 }
  0xcb   :  { %v1024_v49 = vpop.f32.mrf.mxu1 }
  0xcc   :  { %v250_v50 = vadd.f32 %v1021_v43, %v242_v47  ;;  %v249_v51 = vadd.f32 %v242_v47, %v197_v46  ;;  %v246_v52 = vrot.slane %v238_v48, %v1345_v34 }
  0xcd   :  { %v207_v53 = vpop.f32.mrf.mxu1 }
  0xce   :  { %v254_v54 = vmul.f32 0.2, %v250_v50  ;;  %v252_v55 = vadd.f32 %v1024_v49, %v246_v52  ;;  %v251_v56 = vadd.f32 %v246_v52, %v207_v53  ;;  %v253_v57 = vmul.f32 0.2, %v249_v51 }
  0xd0   :  { %v258_v58 = vmax.f32 %v250_v50, %v254_v54  ;;  %v255_v59 = vmul.f32 0.2, %v251_v56  ;;  %v257_v60 = vmax.f32 %v249_v51, %v253_v57  ;;  %v256_v61 = vmul.f32 0.2, %v252_v55  ;;  %v413_v57 = vld [vmem:[%s1598_s2 + $0x230] sm:$0xff] }
  0xd2   :  { %v259_v62 = vmax.f32 %v251_v56, %v255_v59  ;;  %1057 = vmatprep.mubr.f32.mxu0 %v257_v60  ;;  %v260_v3 = vmax.f32 %v252_v55, %v256_v61  ;;  %v380_v55 = vld [vmem:[%s1598_s2 + $0x128] sm:$0xff]  ;;  %v411_v59 = vld [vmem:[%s1598_s2 + $0x220] sm:$0xff]  ;;  %v409_v60 = vld [vmem:[%s1598_s2 + $0x210] sm:$0xff] }
  0xd3   :  { %1058 = vmatmul.mubr.f32.vlgmr.msra.gmra.mxu0 %v258_v58  ;;  %v412_v58 = vld [vmem:[%s1598_s2 + $0x228] sm:$0xff] }
  0xd4   :  { %1060 = vmatprep.mubr.f32.mxu0 %v259_v62  ;;  %1104 = vmatpush3.msra.mxu0 %v379_v25  ;;  %v384_v25 = vld [vmem:[%s1598_s2 + $0x148] sm:$0xff]  ;;  %v407_v62 = vld [vmem:[%s1598_s2 + $0x200] sm:$0xff] }
  0xd5   :  { %1105 = vmatprep.subr.mxu0 %v378_v63  ;;  %1088 = vmatpush3.msra.mxu1 %v384_v25  ;;  %v408_v61 = vld [vmem:[%s1598_s2 + $0x208] sm:$0xff] }
  0xd6   :  { %1106 = vmatpush3.msra.mxu0 %v378_v63  ;;  %1089 = vmatprep.subr.mxu1 %v1217_v0  ;;  %v406_v63 = vld [vmem:[%s1598_s2 + $0x1f8] sm:$0xff] }
  0xd7   :  { %1061 = vmatmul.mubr.f32.gmra.mxu0 %v260_v3  ;;  %1107 = vmatprep.subr.mxu0 %v377_v1  ;;  %v404_v3 = vld [vmem:[%s1598_s2 + $0x1e8] sm:$0xff] }
  0xd8   :  { %1108 = vmatpush3.msra.mxu0 %v377_v1  ;;  %1090 = vmatpush3.msra.mxu1 %v383_v26  ;;  %v405_v1 = vld [vmem:[%s1598_s2 + $0x1f0] sm:$0xff] }
  0xd9   :  { %1109 = vmatprep.subr.mxu0 %v376_v4  ;;  %1091 = vmatprep.subr.mxu1 %v1217_v0 }
  0xda   :  { %1110 = vmatpush3.msra.mxu0 %v376_v4  ;;  %1092 = vmatpush3.msra.mxu1 %v382_v27  ;;  %v403_v4 = vld [vmem:[%s1598_s2 + $0x1e0] sm:$0xff] }
  0xdb   :  { %1111 = vmatprep.subr.mxu0 %v375_v5  ;;  %1093 = vmatprep.subr.mxu1 %v1217_v0 }
  0xdc   :  { %1112 = vmatpush3.msra.mxu0 %v375_v5  ;;  %1094 = vmatpush3.msra.mxu1 %v381_v28  ;;  %v402_v5 = vld [vmem:[%s1598_s2 + $0x1d8] sm:$0xff] }
  0xdd   :  { %1113 = vmatprep.subr.mxu0 %v374_v6  ;;  %1098 = vmatprep.subr.mxu1 %v1217_v0 }
  0xde   :  { %1114 = vmatpush3.msra.mxu0 %v374_v6  ;;  %v401_v6 = vld [vmem:[%s1598_s2 + $0x1d0] sm:$0xff] }
  0xdf   :  { %1115 = vmatprep.subr.mxu0 %v373_v7 }
  0xe0   :  { %1116 = vmatpush3.msra.mxu0 %v373_v7  ;;  %v400_v7 = vld [vmem:[%s1598_s2 + $0x1c8] sm:$0xff] }
  0xe1   :  { %1117 = vmatprep.subr.mxu0 %v372_v8 }
  0xe2   :  { %1118 = vmatpush3.msra.mxu0 %v372_v8  ;;  %v399_v8 = vld [vmem:[%s1598_s2 + $0x1c0] sm:$0xff] }
  0xe3   :  { %1119 = vmatprep.subr.mxu0 %v371_v9 }
  0xe4   :  { %1120 = vmatpush3.msra.mxu0 %v371_v9  ;;  %v398_v9 = vld [vmem:[%s1598_s2 + $0x1b8] sm:$0xff] }
  0xe5   :  { %1121 = vmatprep.subr.mxu0 %v370_v10 }
  0xe6   :  { %1122 = vmatpush3.msra.mxu0 %v370_v10  ;;  %v813_v10 = vld [vmem:[%s1598_s2 + $0x2b8] sm:$0xff] }
  0xe7   :  { %1123 = vmatprep.subr.mxu0 %v369_v11 }
  0xe8   :  { %1124 = vmatpush3.msra.mxu0 %v369_v11  ;;  %v812_v11 = vld [vmem:[%s1598_s2 + $0x2b0] sm:$0xff] }
  0xe9   :  { %1125 = vmatprep.subr.mxu0 %v368_v12 }
  0xea   :  { %1126 = vmatpush3.msra.mxu0 %v368_v12  ;;  %v811_v12 = vld [vmem:[%s1598_s2 + $0x2a8] sm:$0xff] }
  0xeb   :  { %1127 = vmatprep.subr.mxu0 %v367_v13 }
  0xec   :  { %1128 = vmatpush3.msra.mxu0 %v367_v13  ;;  %v810_v13 = vld [vmem:[%s1598_s2 + $0x2a0] sm:$0xff] }
  0xed   :  { %1129 = vmatprep.subr.mxu0 %v366_v14 }
  0xee   :  { %1130 = vmatpush3.msra.mxu0 %v366_v14 }
  0xef   :  { %1131 = vmatprep.subr.mxu0 %v365_v16 }
  0xf0   :  { %1132 = vmatpush3.msra.mxu0 %v365_v16 }
  0xf1   :  { %1133 = vmatprep.subr.mxu0 %v364_v18 }
  0xf2   :  { %1134 = vmatpush3.msra.mxu0 %v364_v18 }
  0xf3   :  { %1179 = vmatprep.subr.mxu0 %v1217_v0 }
 0x193   :  { %v1059_v31 = vpop.f32.mrf.mxu0 }
 0x194   :  { %v337_v33 = vadd.f32 %v1059_v31, %v264_v30 }
 0x195   :  { %v331_v32 = vpop.f32.mrf.mxu0 }
 0x196   :  { %v332_v35 = vadd.f32 %v331_v32, %v264_v30 }
 0x197   :  { %v1062_v36 = vpop.f32.mrf.mxu0 }
 0x198   :  { %v350_v37 = vadd.f32 %v337_v33, %v332_v35  ;;  %1135 = vmatprep.mubr.f32.mxu0 %v332_v35  ;;  %v347_v41 = vadd.f32 %v1062_v36, %v264_v30 }
 0x199   :  { %v341_v39 = vpop.f32.mrf.mxu0  ;;  %1136 = vmatmul.mubr.f32.vlgmr.msra.gmra.mxu0 %v337_v33 }
 0x19a   :  { %v351_v40 = vrot.slane %v350_v37, 4  ;;  %v342_v42 = vadd.f32 %v341_v39, %v264_v30  ;;  %1180 = vmatpush3.msra.mxu0 %v813_v10 }
 0x19b   :  { %1181 = vmatprep.subr.mxu0 %v1217_v0 }
 0x19c   :  { %v352_v43 = vadd.f32 %v351_v40, %v350_v37  ;;  %v357_v44 = vadd.f32 %v347_v41, %v342_v42  ;;  %1138 = vmatprep.mubr.f32.mxu0 %v342_v42  ;;  %1182 = vmatpush3.msra.mxu0 %v812_v11 }
 0x19d   :  { %1139 = vmatmul.mubr.f32.gmra.mxu0 %v347_v41  ;;  %1183 = vmatprep.subr.mxu0 %v1217_v0 }
 0x19e   :  { %v353_v45 = vrot.slane %v352_v43, 2  ;;  %v358_v46 = vrot.slane %v357_v44, 4  ;;  %1211 = vmatprep.mubr.msk.f32.mxu0 %vm1218_vm1, %v1217_v0  ;;  %1184 = vmatpush3.msra.mxu0 %v811_v12 }
 0x19f   :  { %1185 = vmatprep.subr.mxu0 %v1217_v0 }
 0x1a0   :  { %v354_v47 = vadd.f32 %v353_v45, %v352_v43  ;;  %v359_v48 = vadd.f32 %v358_v46, %v357_v44  ;;  %1186 = vmatpush3.msra.mxu0 %v810_v13  ;;  %v809_v45 = vld [vmem:[%s1598_s2 + $0x298] sm:$0xff]  ;;  %v808_v46 = vld [vmem:[%s1598_s2 + $0x290] sm:$0xff] }
 0x1a1   :  { %1187 = vmatprep.subr.mxu0 %v1217_v0 }
 0x1a2   :  { %v360_v49 = vrot.slane %v359_v48, 2  ;;  %v355_v50 = vrot.slane %v354_v47, 1  ;;  %1188 = vmatpush3.msra.mxu0 %v809_v45 }
 0x1a3   :  { %1189 = vmatprep.subr.mxu0 %v1217_v0 }
 0x1a4   :  { %v361_v51 = vadd.f32 %v360_v49, %v359_v48  ;;  %v356_v53 = vadd.f32 %v355_v50, %v354_v47  ;;  %1190 = vmatpush3.msra.mxu0 %v808_v46  ;;  %v807_v47 = vld [vmem:[%s1598_s2 + $0x288] sm:$0xff]  ;;  %v806_v48 = vld [vmem:[%s1598_s2 + $0x280] sm:$0xff]  ;;  %v805_v49 = vld [vmem:[%s1598_s2 + $0x278] sm:$0xff] }
 0x1a5   :  { %1191 = vmatprep.subr.mxu0 %v1217_v0  ;;  %v804_v50 = vld [vmem:[%s1598_s2 + $0x270] sm:$0xff] }
 0x1a6   :  { %v362_v52 = vrot.slane %v361_v51, 1  ;;  %1192 = vmatpush3.msra.mxu0 %v807_v47 }
 0x1a7   :  { %1193 = vmatprep.subr.mxu0 %v1217_v0 }
 0x1a8   :  { %v363_v54 = vadd.f32 %v362_v52, %v361_v51  ;;  %1194 = vmatpush3.msra.mxu0 %v806_v48  ;;  %v803_v51 = vld [vmem:[%s1598_s2 + $0x268] sm:$0xff]  ;;  %v802_v52 = vld [vmem:[%s1598_s2 + $0x260] sm:$0xff] }
 0x1a9   :  { %1195 = vmatprep.subr.mxu0 %v1217_v0 }
 0x1aa   :  { %v418_v56 = vsel %vm417_vm3, %v363_v54, %v356_v53  ;;  %1196 = vmatpush3.msra.mxu0 %v805_v49  ;;  %v801_v53 = vld [vmem:[%s1598_s2 + $0x258] sm:$0xff]  ;;  %v800_v54 = vld [vmem:[%s1598_s2 + $0x250] sm:$0xff] }
 0x1ab   :  { %1096 = vmatmul.mubr.f32.vlgmr.msra.gmra.mxu1 %v418_v56  ;;  %1197 = vmatprep.subr.mxu0 %v1217_v0  ;;  %v798_v56 = vld [vmem:[%s1598_s2 + $0x240] sm:$0xff] }
 0x1ac   :  { %1099 = vmatpush3.msra.mxu1 %v380_v55  ;;  %1100 = vmatprep.mubr.msk.f32.mxu1 %vm1218_vm1, %v1217_v0  ;;  %v799_v55 = vld [vmem:[%s1598_s2 + $0x248] sm:$0xff] }
 0x1ad   :  { %1141 = vmatprep.subr.mxu1 %v413_v57  ;;  %1198 = vmatpush3.msra.mxu0 %v804_v50 }
 0x1ae   :  { %1199 = vmatprep.subr.mxu0 %v1217_v0 }
 0x1af   :  { %1101 = vmatmul.mubr.msk.f32.vlgmr.msra.gmra.mxu1 %vm44_vm0, %v1249_v2  ;;  %v410_v2 = vld [vmem:[%s1598_s2 + $0x218] sm:$0xff]  ;;  %1200 = vmatpush3.msra.mxu0 %v803_v51 }
 0x1b0   :  { %1142 = vmatpush3.msra.mxu1 %v413_v57  ;;  %1201 = vmatprep.subr.mxu0 %v1217_v0  ;;  %v414_v57 = vld [vmem:[%s1598_s2 + $0x238] sm:$0xff] }
 0x1b1   :  { %1143 = vmatprep.subr.mxu1 %v412_v58  ;;  %1202 = vmatpush3.msra.mxu0 %v802_v52 }
 0x1b2   :  { %1144 = vmatpush3.msra.mxu1 %v412_v58  ;;  %1203 = vmatprep.subr.mxu0 %v1217_v0  ;;  %v698_v58 = vrot.slane %v414_v57, %v1345_v34 }
 0x1b3   :  { %1145 = vmatprep.subr.mxu1 %v411_v59  ;;  %1204 = vmatpush3.msra.mxu0 %v801_v53 }
 0x1b4   :  { %1146 = vmatpush3.msra.mxu1 %v411_v59  ;;  %1205 = vmatprep.subr.mxu0 %v1217_v0 }
 0x1b5   :  { %1147 = vmatprep.subr.mxu1 %v410_v2  ;;  %1206 = vmatpush3.msra.mxu0 %v800_v54 }
 0x1b6   :  { %1148 = vmatpush3.msra.mxu1 %v410_v2  ;;  %1207 = vmatprep.subr.mxu0 %v1217_v0 }
 0x1b7   :  { %1149 = vmatprep.subr.mxu1 %v409_v60  ;;  %1208 = vmatpush3.msra.mxu0 %v799_v55 }
 0x1b8   :  { %1150 = vmatpush3.msra.mxu1 %v409_v60  ;;  %1209 = vmatprep.subr.mxu0 %v1217_v0 }
 0x1b9   :  { %1151 = vmatprep.subr.mxu1 %v408_v61  ;;  %1210 = vmatpush3.msra.mxu0 %v798_v56 }
 0x1ba   :  { %1152 = vmatpush3.msra.mxu1 %v408_v61 }
 0x1bb   :  { %1153 = vmatprep.subr.mxu1 %v407_v62 }
 0x1bc   :  { %1154 = vmatpush3.msra.mxu1 %v407_v62 }
 0x1bd   :  { %1155 = vmatprep.subr.mxu1 %v406_v63 }
 0x1be   :  { %1156 = vmatpush3.msra.mxu1 %v406_v63 }
 0x1bf   :  { %1157 = vmatprep.subr.mxu1 %v405_v1 }
 0x1c0   :  { %1158 = vmatpush3.msra.mxu1 %v405_v1 }
 0x1c1   :  { %1159 = vmatprep.subr.mxu1 %v404_v3 }
 0x1c2   :  { %1160 = vmatpush3.msra.mxu1 %v404_v3 }
 0x1c3   :  { %1161 = vmatprep.subr.mxu1 %v403_v4 }
 0x1c4   :  { %1162 = vmatpush3.msra.mxu1 %v403_v4 }
 0x1c5   :  { %1163 = vmatprep.subr.mxu1 %v402_v5 }
 0x1c6   :  { %1164 = vmatpush3.msra.mxu1 %v402_v5 }
 0x1c7   :  { %1165 = vmatprep.subr.mxu1 %v401_v6 }
 0x1c8   :  { %1166 = vmatpush3.msra.mxu1 %v401_v6 }
 0x1c9   :  { %1167 = vmatprep.subr.mxu1 %v400_v7 }
 0x1ca   :  { %1168 = vmatpush3.msra.mxu1 %v400_v7 }
 0x1cb   :  { %1169 = vmatprep.subr.mxu1 %v399_v8 }
 0x1cc   :  { %1170 = vmatpush3.msra.mxu1 %v399_v8 }
 0x1cd   :  { %1171 = vmatprep.subr.mxu1 %v398_v9 }
 0x1ce   :  { %1172 = vmatpush3.msra.mxu1 %v398_v9 }
 0x259   :  { %v1137_v18 = vpop.f32.mrf.mxu0 }
 0x25b   :  { %v631_v23 = vpop.f32.mrf.mxu0 }
 0x25d   :  { %v1140_v27 = vpop.f32.mrf.mxu0 }
 0x25f   :  { %v641_v33 = vpop.f32.mrf.mxu0 }
 0x26b   :  { %v486_v14 = vpop.f32.mrf.mxu1 }
 0x26d   :  { %v1097_v16 = vpop.f32.mrf.mxu1 }
 0x26f   :  { %v556_v19 = vpop.f32.mrf.mxu1 }
 0x270   :  { %v557_v20 = vadd.f32 %v556_v19, %v486_v14 }
 0x271   :  { %v1102_v21 = vpop.f32.mrf.mxu1 }
 0x272   :  { %v564_v22 = vadd.f32 %v563_v17, %v557_v20 }
 0x274   :  { %v657_v24 = vrot.slane %v564_v22, %v1351_v38 }
 0x276   :  { %v658_v25 = vcombine.high %v657_v24, %v657_v24  ;;  %v665_v26 = vrot.slane %v657_v24, %v1351_v38 }
 0x278   :  { %v672_v28 = vrot.slane %v658_v25, %v1351_v38  ;;  %v676_v29 = vrot.slane %v665_v26, %v1345_v34 }
 0x27a   :  { %v683_v30 = vadd.f32 %v676_v29, %v631_v23  ;;  %v684_v31 = vadd.f32 %v1137_v18, %v676_v29  ;;  %v680_v32 = vrot.slane %v672_v28, %v1345_v34  ;;  %v814_v18 = vld [vmem:[%s1598_s2 + $0x2c0] sm:$0xff] }
 0x27b   :  { %v818_v19 = vrot.slane %v814_v18, %v1345_v34 }
 0x27c   :  { %v687_v35 = vmul.f32 0.2, %v683_v30  ;;  %v688_v36 = vmul.f32 0.2, %v684_v31  ;;  %v685_v37 = vadd.f32 %v680_v32, %v641_v33  ;;  %v686_v39 = vadd.f32 %v1140_v27, %v680_v32 }
 0x27e   :  { %v691_v40 = vmax.f32 %v683_v30, %v687_v35  ;;  %v692_v41 = vmax.f32 %v684_v31, %v688_v36  ;;  %v689_v42 = vmul.f32 0.2, %v685_v37  ;;  %v690_v43 = vmul.f32 0.2, %v686_v39 }
 0x280   :  { %1173 = vmatprep.mubr.f32.mxu1 %v691_v40  ;;  %v693_v44 = vmax.f32 %v685_v37, %v689_v42  ;;  %v694_v38 = vmax.f32 %v686_v39, %v690_v43 }
 0x281   :  { %1174 = vmatmul.mubr.f32.vlgmr.msra.gmra.mxu1 %v692_v41 }
 0x282   :  { %1176 = vmatprep.mubr.f32.mxu1 %v693_v44 }
 0x285   :  { %1177 = vmatmul.mubr.f32.gmra.mxu1 %v694_v38 }
 0x341   :  { %v1175_v59 = vpop.f32.mrf.mxu1 }
 0x342   :  { %v771_v60 = vadd.f32 %v1175_v59, %v698_v58 }
 0x343   :  { %v765_v2 = vpop.f32.mrf.mxu1 }
 0x344   :  { %v766_v61 = vadd.f32 %v765_v2, %v698_v58 }
 0x345   :  { %v1178_v62 = vpop.f32.mrf.mxu1 }
 0x346   :  { %v784_v63 = vadd.f32 %v771_v60, %v766_v61  ;;  %v781_v4 = vadd.f32 %v1178_v62, %v698_v58 }
 0x347   :  { %v775_v1 = vpop.f32.mrf.mxu1 }
 0x348   :  { %v785_v3 = vrot.slane %v784_v63, 4  ;;  %v776_v5 = vadd.f32 %v775_v1, %v698_v58 }
 0x34a   :  { %v786_v6 = vadd.f32 %v785_v3, %v784_v63  ;;  %v791_v7 = vadd.f32 %v781_v4, %v776_v5 }
 0x34c   :  { %v787_v0 = vrot.slane %v786_v6, 2  ;;  %v792_v8 = vrot.slane %v791_v7, 4 }
 0x34e   :  { %v788_v9 = vadd.f32 %v787_v0, %v786_v6  ;;  %v793_v10 = vadd.f32 %v792_v8, %v791_v7 }
 0x350   :  { %v794_v11 = vrot.slane %v793_v10, 2  ;;  %v789_v12 = vrot.slane %v788_v9, 1 }
 0x352   :  { %v795_v13 = vadd.f32 %v794_v11, %v793_v10  ;;  %v790_v15 = vadd.f32 %v789_v12, %v788_v9 }
 0x354   :  { %v796_v14 = vrot.slane %v795_v13, 1 }
 0x356   :  { %v797_v16 = vadd.f32 %v796_v14, %v795_v13 }
 0x358   :  { %v821_v17 = vsel %vm417_vm3, %v797_v16, %v790_v15 }
 0x359   :  { %1212 = vmatmul.mubr.f32.vlgmr.msra.gmra.mxu0 %v821_v17 }
 0x419   :  { %v889_v20 = vpop.f32.mrf.mxu0 }
 0x41a   :  { %v890_v21 = vadd.f32 %v889_v20, %v818_v19 }
 0x41b   :  { %v1213_v22 = vpop.f32.mrf.mxu0 }
 0x41c   :  { %v894_v23 = vsel %vm893_vm4, %v890_v21, 0.0 }
 0x41d   :  { %895 = vst [vmem:[%s1601_s3] sm:$0xff] %v894_v23 }

</bundles_post_ra>
